<compile_context>
chip_gen: v6e
topology: v6e:2x2x1
jax: 0.10.0
libtpu: 0.0.40
codegen_flags: <defaults>
</compile_context>

<pallas_src>
import functools

import numpy as np
import jax
import jax.numpy as jnp
from jax import lax
from jax.experimental import pallas as pl
from jax.experimental.pallas import tpu as pltpu


def _elu(x):
    # ELU with alpha=1 (torch.nn.functional.elu default); clamp arg of exp to avoid inf.
    return jnp.where(x > 0, x, jnp.exp(jnp.minimum(x, 0.0)) - 1.0)


# ----------------------------- Pallas kernel ------------------------------- #

def _cloning_block_kernel(x_ref, w_in_ref, b_in_ref, w_map_ref, b_map_ref, o_ref,
                          *, d_model, n_heads):
    # TODO(synk): optional attention `mask` argument not implemented (mask=None path only).
    x = x_ref[0].astype(jnp.float32)                                   # (N, H)
    n = x.shape[0]
    d = d_model
    dh = d // n_heads
    scale = 1.0 / float(np.sqrt(dh))

    # One packed projection: [q | k | v | xt] = x @ W_in + b_in  (single MXU matmul).
    y = jnp.dot(x, w_in_ref[...], preferred_element_type=jnp.float32) + b_in_ref[...]
    qkv = _elu(y[:, : 3 * d])                                          # (N, 3D)
    xt = y[:, 3 * d:]                                                  # (N, E)

    # Folded (attention out-proj ∘ mapping_linear) weight: (1, D) vector + scalar bias.
    w_map = w_map_ref[...]                                             # (1, D)
    m = jnp.broadcast_to(b_map_ref[...], (n, 1)).astype(jnp.float32)   # (N, 1)

    # Multi-head scaled-dot-product attention, head loop fully unrolled (static).
    for h in range(n_heads):
        lo = h * dh
        qh = qkv[:, lo:lo + dh]                                        # (N, dh)
        kh = qkv[:, d + lo:d + lo + dh]                                # (N, dh)
        vh = qkv[:, 2 * d + lo:2 * d + lo + dh]                        # (N, dh)
        s = lax.dot_general(qh, kh, (((1,), (1,)), ((), ())),
                            preferred_element_type=jnp.float32) * scale  # (N, N)
        s = s - jnp.max(s, axis=-1, keepdims=True)
        p = jnp.exp(s)
        p = p / jnp.sum(p, axis=-1, keepdims=True)
        ctx_h = jnp.dot(p, vh, preferred_element_type=jnp.float32)     # (N, dh)
        # Per-head slice of the folded mapping vector: VPU multiply + lane reduce.
        m = m + jnp.sum(ctx_h * w_map[:, lo:lo + dh], axis=-1, keepdims=True)

    m = m / (1.0 + jnp.abs(m))                                         # softsign

    # out = m^T @ xt : broadcast-multiply + sublane reduction -> (1, E)
    out = jnp.sum(m * xt, axis=0, keepdims=True)
    o_ref[0] = out.astype(o_ref.dtype)


def cloning_block_pallas(x, packed_params, *, d_model, n_heads):
    """x: (B, N, H) float32; packed_params = (w_in, b_in, w_map, b_map)."""
    B, N, H = x.shape
    w_in, b_in, w_map, b_map = packed_params
    P = w_in.shape[1]                      # 3*d_model + embedding_dim
    E = P - 3 * d_model

    kernel = functools.partial(_cloning_block_kernel,
                               d_model=d_model, n_heads=n_heads)
    grid_spec = pltpu.PrefetchScalarGridSpec(
        num_scalar_prefetch=0,
        grid=(B,),
        in_specs=[
            pl.BlockSpec((1, N, H), lambda b: (b, 0, 0)),
            pl.BlockSpec((H, P), lambda b: (0, 0)),
            pl.BlockSpec((1, P), lambda b: (0, 0)),
            pl.BlockSpec((1, d_model), lambda b: (0, 0)),
            pl.BlockSpec((1, 1), lambda b: (0, 0)),
        ],
        out_specs=pl.BlockSpec((1, 1, E), lambda b: (b, 0, 0)),
    )
    out = pl.pallas_call(
        kernel,
        out_shape=jax.ShapeDtypeStruct((B, 1, E), x.dtype),
        grid_spec=grid_spec,
        compiler_params=pltpu.CompilerParams(
            dimension_semantics=("parallel",)),
    )(x, w_in, b_in, w_map, b_map)
    return out[:, 0, :]


# ------------------------ parameter setup (plain JAX) ----------------------- #

def init_params(key, hidden_dim, embedding_dim, d_model):
    """Raw per-layer params (math layout: y = x @ W + b) + kernel-packed params."""
    def linear(k, fan_in, fan_out):
        kw, kb = jax.random.split(k)
        bound = 1.0 / np.sqrt(fan_in)
        w = jax.random.uniform(kw, (fan_in, fan_out), jnp.float32, -bound, bound)
        b = jax.random.uniform(kb, (fan_out,), jnp.float32, -bound, bound)
        return w, b

    keys = jax.random.split(key, 6)
    wq, bq = linear(keys[0], hidden_dim, d_model)
    wk, bk = linear(keys[1], hidden_dim, d_model)
    wv, bv = linear(keys[2], hidden_dim, d_model)
    we, be = linear(keys[3], hidden_dim, embedding_dim)
    wo, bo = linear(keys[4], d_model, d_model)     # MHA output projection
    wm, bm = linear(keys[5], d_model, 1)           # mapping_linear

    raw = dict(wq=wq, bq=bq, wk=wk, bk=bk, wv=wv, bv=bv,
               we=we, be=be, wo=wo, bo=bo, wm=wm, bm=bm)

    # Host-side, exact algebraic packing/folds for the kernel.
    w_in = jnp.concatenate([wq, wk, wv, we], axis=1)            # (H, 3D+E)
    b_in = jnp.concatenate([bq, bk, bv, be])[None, :]           # (1, 3D+E)
    w_map = (wo @ wm).reshape(1, d_model)                       # (1, D)  = (Wo Wm)^T
    b_map = (bo @ wm + bm).reshape(1, 1)                        # (1, 1)
    packed = (w_in, b_in, w_map, b_map)
    return packed, raw


# ------------------------------ JAX reference ------------------------------- #

def ref_forward(x, p, n_heads):
    q = _elu(x @ p["wq"] + p["bq"])
    k = _elu(x @ p["wk"] + p["bk"])
    v = _elu(x @ p["wv"] + p["bv"])
    xt = x @ p["we"] + p["be"]
    B, N, D = q.shape
    dh = D // n_heads
    qh = q.reshape(B, N, n_heads, dh).transpose(0, 2, 1, 3)
    kh = k.reshape(B, N, n_heads, dh).transpose(0, 2, 1, 3)
    vh = v.reshape(B, N, n_heads, dh).transpose(0, 2, 1, 3)
    s = jnp.einsum("bhnd,bhmd->bhnm", qh, kh) / np.sqrt(dh)
    a = jax.nn.softmax(s, axis=-1)
    ctx = jnp.einsum("bhnm,bhmd->bhnd", a, vh)
    ctx = ctx.transpose(0, 2, 1, 3).reshape(B, N, D)
    attn_out = ctx @ p["wo"] + p["bo"]
    m = attn_out @ p["wm"] + p["bm"]              # (B, N, 1)
    m = m / (1.0 + jnp.abs(m))                    # softsign
    out = jnp.matmul(jnp.swapaxes(m, -1, -2), xt) # (B, 1, E)
    return out[:, 0, :]


# ----------------------------------- main ----------------------------------- #

if __name__ == "__main__":
    batch, n_samples = 2, 8
    hidden_dim, embedding_dim = 32, 16
    d_model, n_heads = 32, 4

    root = jax.random.PRNGKey(0)
    kx, kp = jax.random.split(root)
    x = jax.random.normal(kx, (batch, n_samples, hidden_dim), jnp.float32)

    packed, raw = init_params(kp, hidden_dim, embedding_dim, d_model)

    out = cloning_block_pallas(x, packed, d_model=d_model, n_heads=n_heads)
    out = jax.block_until_ready(out)

    ref = ref_forward(x, raw, n_heads)
    assert out.shape == (batch, embedding_dim)
    np.testing.assert_allclose(np.asarray(out), np.asarray(ref),
                               atol=1e-4, rtol=1e-4)
    print("KERNEL_OK")
</pallas_src>

<mosaic_0001>
module attributes {stable_mosaic.version = 11 : i64} {
  func.func @_cloning_block_kernel(%arg0: i32, %arg1: memref<1x8x32xf32, #tpu.memory_space<vmem>>, %arg2: memref<32x112xf32, #tpu.memory_space<vmem>>, %arg3: memref<1x112xf32, #tpu.memory_space<vmem>>, %arg4: memref<1x32xf32, #tpu.memory_space<vmem>>, %arg5: memref<1x1xf32, #tpu.memory_space<vmem>>, %arg6: memref<1x1x16xf32, #tpu.memory_space<vmem>>) attributes {dimension_semantics = [#tpu.dimension_semantics<parallel>], iteration_bounds = array<i64: 2>, scalar_prefetch = 0 : i64, scratch_operands = 0 : i64, tpu.core_type = #tpu.core_type<tc>, window_params = [{transform_indices = @transform_0, window_bounds = array<i64: 1, 8, 32>}, {pipeline_mode = #tpu.pipeline_mode<synchronous>, transform_indices = @transform_1, window_bounds = array<i64: 32, 112>}, {pipeline_mode = #tpu.pipeline_mode<synchronous>, transform_indices = @transform_2, window_bounds = array<i64: 1, 112>}, {pipeline_mode = #tpu.pipeline_mode<synchronous>, transform_indices = @transform_3, window_bounds = array<i64: 1, 32>}, {pipeline_mode = #tpu.pipeline_mode<synchronous>, transform_indices = @transform_4, window_bounds = array<i64: 1, 1>}, {transform_indices = @transform_5, window_bounds = array<i64: 1, 1, 16>}]} {
    %c0 = arith.constant 0 : index
    %c0_0 = arith.constant 0 : index
    %c0_1 = arith.constant 0 : index
    %0 = vector.load %arg1[%c0, %c0_0, %c0_1] : memref<1x8x32xf32, #tpu.memory_space<vmem>>, vector<1x8x32xf32>
    %1 = vector.shape_cast %0 : vector<1x8x32xf32> to vector<8x32xf32>
    %c0_2 = arith.constant 0 : index
    %c0_3 = arith.constant 0 : index
    %2 = vector.load %arg2[%c0_2, %c0_3] : memref<32x112xf32, #tpu.memory_space<vmem>>, vector<32x112xf32>
    %cst = arith.constant dense<0.000000e+00> : vector<8x112xf32>
    %3 = tpu.matmul %1, %2, %cst {dimension_numbers = #tpu.dot_dimension_numbers<[1], [0], [0], [1], [0, 0, 1, 1], [], []>} : vector<8x32xf32>, vector<32x112xf32>, vector<8x112xf32> -> vector<8x112xf32>
    %c0_4 = arith.constant 0 : index
    %c0_5 = arith.constant 0 : index
    %4 = vector.load %arg3[%c0_4, %c0_5] : memref<1x112xf32, #tpu.memory_space<vmem>>, vector<1x112xf32>
    %5 = vector.broadcast %4 : vector<1x112xf32> to vector<8x112xf32>
    %6 = arith.addf %3, %5 : vector<8x112xf32>
    %7 = vector.extract_strided_slice %6 {offsets = [0, 0], sizes = [8, 96], strides = [1, 1]} : vector<8x112xf32> to vector<8x96xf32>
    %cst_6 = arith.constant 0.000000e+00 : f32
    %8 = vector.broadcast %cst_6 : f32 to vector<8x96xf32>
    %9 = arith.cmpf ogt, %7, %8 : vector<8x96xf32>
    %cst_7 = arith.constant 0.000000e+00 : f32
    %10 = vector.broadcast %cst_7 : f32 to vector<8x96xf32>
    %11 = arith.minimumf %7, %10 : vector<8x96xf32>
    %12 = math.exp %11 : vector<8x96xf32>
    %cst_8 = arith.constant 1.000000e+00 : f32
    %13 = vector.broadcast %cst_8 : f32 to vector<8x96xf32>
    %14 = arith.subf %12, %13 : vector<8x96xf32>
    %15 = arith.select %9, %7, %14 : vector<8x96xi1>, vector<8x96xf32>
    %16 = vector.extract_strided_slice %6 {offsets = [0, 96], sizes = [8, 16], strides = [1, 1]} : vector<8x112xf32> to vector<8x16xf32>
    %c0_9 = arith.constant 0 : index
    %c0_10 = arith.constant 0 : index
    %17 = vector.load %arg4[%c0_9, %c0_10] : memref<1x32xf32, #tpu.memory_space<vmem>>, vector<1x32xf32>
    %c0_11 = arith.constant 0 : index
    %c0_12 = arith.constant 0 : index
    %18 = vector.load %arg5[%c0_11, %c0_12] : memref<1x1xf32, #tpu.memory_space<vmem>>, vector<1x1xf32>
    %19 = vector.shape_cast %18 : vector<1x1xf32> to vector<1x1xf32>
    %20 = vector.broadcast %19 : vector<1x1xf32> to vector<8x1xf32>
    %21 = vector.extract_strided_slice %15 {offsets = [0, 0], sizes = [8, 8], strides = [1, 1]} : vector<8x96xf32> to vector<8x8xf32>
    %22 = vector.extract_strided_slice %15 {offsets = [0, 32], sizes = [8, 8], strides = [1, 1]} : vector<8x96xf32> to vector<8x8xf32>
    %23 = vector.extract_strided_slice %15 {offsets = [0, 64], sizes = [8, 8], strides = [1, 1]} : vector<8x96xf32> to vector<8x8xf32>
    %cst_13 = arith.constant dense<0.000000e+00> : vector<8x8xf32>
    %24 = tpu.matmul %21, %22, %cst_13 {dimension_numbers = #tpu.dot_dimension_numbers<[1], [1], [0], [0], [0, 0, 1, 0], [], []>} : vector<8x8xf32>, vector<8x8xf32>, vector<8x8xf32> -> vector<8x8xf32>
    %cst_14 = arith.constant 0.353553385 : f32
    %25 = vector.broadcast %cst_14 : f32 to vector<8x8xf32>
    %26 = arith.mulf %24, %25 : vector<8x8xf32>
    %cst_15 = arith.constant dense<0xFF800000> : vector<8xf32>
    %27 = vector.multi_reduction <maximumf>, %26, %cst_15 [1] : vector<8x8xf32> to vector<8xf32>
    %28 = vector.shape_cast %27 : vector<8xf32> to vector<8x1xf32>
    %29 = vector.broadcast %28 : vector<8x1xf32> to vector<8x8xf32>
    %30 = arith.subf %26, %29 : vector<8x8xf32>
    %31 = math.exp %30 : vector<8x8xf32>
    %cst_16 = arith.constant dense<0.000000e+00> : vector<8xf32>
    %32 = vector.multi_reduction <add>, %31, %cst_16 [1] : vector<8x8xf32> to vector<8xf32>
    %33 = vector.shape_cast %32 : vector<8xf32> to vector<8x1xf32>
    %34 = vector.broadcast %33 : vector<8x1xf32> to vector<8x8xf32>
    %35 = arith.divf %31, %34 : vector<8x8xf32>
    %cst_17 = arith.constant dense<0.000000e+00> : vector<8x8xf32>
    %36 = tpu.matmul %35, %23, %cst_17 {dimension_numbers = #tpu.dot_dimension_numbers<[1], [0], [0], [1], [0, 0, 1, 1], [], []>} : vector<8x8xf32>, vector<8x8xf32>, vector<8x8xf32> -> vector<8x8xf32>
    %37 = vector.extract_strided_slice %17 {offsets = [0, 0], sizes = [1, 8], strides = [1, 1]} : vector<1x32xf32> to vector<1x8xf32>
    %38 = vector.broadcast %37 : vector<1x8xf32> to vector<8x8xf32>
    %39 = arith.mulf %36, %38 : vector<8x8xf32>
    %cst_18 = arith.constant dense<0.000000e+00> : vector<8xf32>
    %40 = vector.multi_reduction <add>, %39, %cst_18 [1] : vector<8x8xf32> to vector<8xf32>
    %41 = vector.shape_cast %40 : vector<8xf32> to vector<8x1xf32>
    %42 = arith.addf %20, %41 : vector<8x1xf32>
    %43 = vector.extract_strided_slice %15 {offsets = [0, 8], sizes = [8, 8], strides = [1, 1]} : vector<8x96xf32> to vector<8x8xf32>
    %44 = vector.extract_strided_slice %15 {offsets = [0, 40], sizes = [8, 8], strides = [1, 1]} : vector<8x96xf32> to vector<8x8xf32>
    %45 = vector.extract_strided_slice %15 {offsets = [0, 72], sizes = [8, 8], strides = [1, 1]} : vector<8x96xf32> to vector<8x8xf32>
    %cst_19 = arith.constant dense<0.000000e+00> : vector<8x8xf32>
    %46 = tpu.matmul %43, %44, %cst_19 {dimension_numbers = #tpu.dot_dimension_numbers<[1], [1], [0], [0], [0, 0, 1, 0], [], []>} : vector<8x8xf32>, vector<8x8xf32>, vector<8x8xf32> -> vector<8x8xf32>
    %cst_20 = arith.constant 0.353553385 : f32
    %47 = vector.broadcast %cst_20 : f32 to vector<8x8xf32>
    %48 = arith.mulf %46, %47 : vector<8x8xf32>
    %cst_21 = arith.constant dense<0xFF800000> : vector<8xf32>
    %49 = vector.multi_reduction <maximumf>, %48, %cst_21 [1] : vector<8x8xf32> to vector<8xf32>
    %50 = vector.shape_cast %49 : vector<8xf32> to vector<8x1xf32>
    %51 = vector.broadcast %50 : vector<8x1xf32> to vector<8x8xf32>
    %52 = arith.subf %48, %51 : vector<8x8xf32>
    %53 = math.exp %52 : vector<8x8xf32>
    %cst_22 = arith.constant dense<0.000000e+00> : vector<8xf32>
    %54 = vector.multi_reduction <add>, %53, %cst_22 [1] : vector<8x8xf32> to vector<8xf32>
    %55 = vector.shape_cast %54 : vector<8xf32> to vector<8x1xf32>
    %56 = vector.broadcast %55 : vector<8x1xf32> to vector<8x8xf32>
    %57 = arith.divf %53, %56 : vector<8x8xf32>
    %cst_23 = arith.constant dense<0.000000e+00> : vector<8x8xf32>
    %58 = tpu.matmul %57, %45, %cst_23 {dimension_numbers = #tpu.dot_dimension_numbers<[1], [0], [0], [1], [0, 0, 1, 1], [], []>} : vector<8x8xf32>, vector<8x8xf32>, vector<8x8xf32> -> vector<8x8xf32>
    %59 = vector.extract_strided_slice %17 {offsets = [0, 8], sizes = [1, 8], strides = [1, 1]} : vector<1x32xf32> to vector<1x8xf32>
    %60 = vector.broadcast %59 : vector<1x8xf32> to vector<8x8xf32>
    %61 = arith.mulf %58, %60 : vector<8x8xf32>
    %cst_24 = arith.constant dense<0.000000e+00> : vector<8xf32>
    %62 = vector.multi_reduction <add>, %61, %cst_24 [1] : vector<8x8xf32> to vector<8xf32>
    %63 = vector.shape_cast %62 : vector<8xf32> to vector<8x1xf32>
    %64 = arith.addf %42, %63 : vector<8x1xf32>
    %65 = vector.extract_strided_slice %15 {offsets = [0, 16], sizes = [8, 8], strides = [1, 1]} : vector<8x96xf32> to vector<8x8xf32>
    %66 = vector.extract_strided_slice %15 {offsets = [0, 48], sizes = [8, 8], strides = [1, 1]} : vector<8x96xf32> to vector<8x8xf32>
    %67 = vector.extract_strided_slice %15 {offsets = [0, 80], sizes = [8, 8], strides = [1, 1]} : vector<8x96xf32> to vector<8x8xf32>
    %cst_25 = arith.constant dense<0.000000e+00> : vector<8x8xf32>
    %68 = tpu.matmul %65, %66, %cst_25 {dimension_numbers = #tpu.dot_dimension_numbers<[1], [1], [0], [0], [0, 0, 1, 0], [], []>} : vector<8x8xf32>, vector<8x8xf32>, vector<8x8xf32> -> vector<8x8xf32>
    %cst_26 = arith.constant 0.353553385 : f32
    %69 = vector.broadcast %cst_26 : f32 to vector<8x8xf32>
    %70 = arith.mulf %68, %69 : vector<8x8xf32>
    %cst_27 = arith.constant dense<0xFF800000> : vector<8xf32>
    %71 = vector.multi_reduction <maximumf>, %70, %cst_27 [1] : vector<8x8xf32> to vector<8xf32>
    %72 = vector.shape_cast %71 : vector<8xf32> to vector<8x1xf32>
    %73 = vector.broadcast %72 : vector<8x1xf32> to vector<8x8xf32>
    %74 = arith.subf %70, %73 : vector<8x8xf32>
    %75 = math.exp %74 : vector<8x8xf32>
    %cst_28 = arith.constant dense<0.000000e+00> : vector<8xf32>
    %76 = vector.multi_reduction <add>, %75, %cst_28 [1] : vector<8x8xf32> to vector<8xf32>
    %77 = vector.shape_cast %76 : vector<8xf32> to vector<8x1xf32>
    %78 = vector.broadcast %77 : vector<8x1xf32> to vector<8x8xf32>
    %79 = arith.divf %75, %78 : vector<8x8xf32>
    %cst_29 = arith.constant dense<0.000000e+00> : vector<8x8xf32>
    %80 = tpu.matmul %79, %67, %cst_29 {dimension_numbers = #tpu.dot_dimension_numbers<[1], [0], [0], [1], [0, 0, 1, 1], [], []>} : vector<8x8xf32>, vector<8x8xf32>, vector<8x8xf32> -> vector<8x8xf32>
    %81 = vector.extract_strided_slice %17 {offsets = [0, 16], sizes = [1, 8], strides = [1, 1]} : vector<1x32xf32> to vector<1x8xf32>
    %82 = vector.broadcast %81 : vector<1x8xf32> to vector<8x8xf32>
    %83 = arith.mulf %80, %82 : vector<8x8xf32>
    %cst_30 = arith.constant dense<0.000000e+00> : vector<8xf32>
    %84 = vector.multi_reduction <add>, %83, %cst_30 [1] : vector<8x8xf32> to vector<8xf32>
    %85 = vector.shape_cast %84 : vector<8xf32> to vector<8x1xf32>
    %86 = arith.addf %64, %85 : vector<8x1xf32>
    %87 = vector.extract_strided_slice %15 {offsets = [0, 24], sizes = [8, 8], strides = [1, 1]} : vector<8x96xf32> to vector<8x8xf32>
    %88 = vector.extract_strided_slice %15 {offsets = [0, 56], sizes = [8, 8], strides = [1, 1]} : vector<8x96xf32> to vector<8x8xf32>
    %89 = vector.extract_strided_slice %15 {offsets = [0, 88], sizes = [8, 8], strides = [1, 1]} : vector<8x96xf32> to vector<8x8xf32>
    %cst_31 = arith.constant dense<0.000000e+00> : vector<8x8xf32>
    %90 = tpu.matmul %87, %88, %cst_31 {dimension_numbers = #tpu.dot_dimension_numbers<[1], [1], [0], [0], [0, 0, 1, 0], [], []>} : vector<8x8xf32>, vector<8x8xf32>, vector<8x8xf32> -> vector<8x8xf32>
    %cst_32 = arith.constant 0.353553385 : f32
    %91 = vector.broadcast %cst_32 : f32 to vector<8x8xf32>
    %92 = arith.mulf %90, %91 : vector<8x8xf32>
    %cst_33 = arith.constant dense<0xFF800000> : vector<8xf32>
    %93 = vector.multi_reduction <maximumf>, %92, %cst_33 [1] : vector<8x8xf32> to vector<8xf32>
    %94 = vector.shape_cast %93 : vector<8xf32> to vector<8x1xf32>
    %95 = vector.broadcast %94 : vector<8x1xf32> to vector<8x8xf32>
    %96 = arith.subf %92, %95 : vector<8x8xf32>
    %97 = math.exp %96 : vector<8x8xf32>
    %cst_34 = arith.constant dense<0.000000e+00> : vector<8xf32>
    %98 = vector.multi_reduction <add>, %97, %cst_34 [1] : vector<8x8xf32> to vector<8xf32>
    %99 = vector.shape_cast %98 : vector<8xf32> to vector<8x1xf32>
    %100 = vector.broadcast %99 : vector<8x1xf32> to vector<8x8xf32>
    %101 = arith.divf %97, %100 : vector<8x8xf32>
    %cst_35 = arith.constant dense<0.000000e+00> : vector<8x8xf32>
    %102 = tpu.matmul %101, %89, %cst_35 {dimension_numbers = #tpu.dot_dimension_numbers<[1], [0], [0], [1], [0, 0, 1, 1], [], []>} : vector<8x8xf32>, vector<8x8xf32>, vector<8x8xf32> -> vector<8x8xf32>
    %103 = vector.extract_strided_slice %17 {offsets = [0, 24], sizes = [1, 8], strides = [1, 1]} : vector<1x32xf32> to vector<1x8xf32>
    %104 = vector.broadcast %103 : vector<1x8xf32> to vector<8x8xf32>
    %105 = arith.mulf %102, %104 : vector<8x8xf32>
    %cst_36 = arith.constant dense<0.000000e+00> : vector<8xf32>
    %106 = vector.multi_reduction <add>, %105, %cst_36 [1] : vector<8x8xf32> to vector<8xf32>
    %107 = vector.shape_cast %106 : vector<8xf32> to vector<8x1xf32>
    %108 = arith.addf %86, %107 : vector<8x1xf32>
    %109 = math.absf %108 : vector<8x1xf32>
    %cst_37 = arith.constant 1.000000e+00 : f32
    %110 = vector.broadcast %cst_37 : f32 to vector<8x1xf32>
    %111 = arith.addf %110, %109 : vector<8x1xf32>
    %112 = arith.divf %108, %111 : vector<8x1xf32>
    %113 = vector.broadcast %112 : vector<8x1xf32> to vector<8x16xf32>
    %114 = arith.mulf %113, %16 : vector<8x16xf32>
    %cst_38 = arith.constant dense<0.000000e+00> : vector<16xf32>
    %115 = vector.multi_reduction <add>, %114, %cst_38 [0] : vector<8x16xf32> to vector<16xf32>
    %116 = vector.shape_cast %115 : vector<16xf32> to vector<1x16xf32>
    %c0_39 = arith.constant 0 : index
    %c0_40 = arith.constant 0 : index
    %c0_41 = arith.constant 0 : index
    %117 = vector.load %arg6[%c0_39, %c0_40, %c0_41] : memref<1x1x16xf32, #tpu.memory_space<vmem>>, vector<1x1x16xf32>
    %118 = vector.shape_cast %117 : vector<1x1x16xf32> to vector<1x16xf32>
    %119 = vector.shape_cast %116 : vector<1x16xf32> to vector<1x1x16xf32>
    tpu.vector_store %arg6[%c0_39, %c0_40, %c0_41], %119 {strides = array<i32>} : memref<1x1x16xf32, #tpu.memory_space<vmem>>, vector<1x1x16xf32>,
    return
  }
  func.func @transform_0(%arg0: i32) -> (i32, i32, i32) {
    %c0_i32 = arith.constant 0 : i32
    %c0_i32_0 = arith.constant 0 : i32
    %c0_i32_1 = arith.constant 0 : i32
    return %arg0, %c0_i32, %c0_i32_0 : i32, i32, i32
  }
  func.func @transform_1(%arg0: i32) -> (i32, i32) {
    %c0_i32 = arith.constant 0 : i32
    %c0_i32_0 = arith.constant 0 : i32
    %c0_i32_1 = arith.constant 0 : i32
    return %c0_i32, %c0_i32_0 : i32, i32
  }
  func.func @transform_2(%arg0: i32) -> (i32, i32) {
    %c0_i32 = arith.constant 0 : i32
    %c0_i32_0 = arith.constant 0 : i32
    %c0_i32_1 = arith.constant 0 : i32
    return %c0_i32, %c0_i32_0 : i32, i32
  }
  func.func @transform_3(%arg0: i32) -> (i32, i32) {
    %c0_i32 = arith.constant 0 : i32
    %c0_i32_0 = arith.constant 0 : i32
    %c0_i32_1 = arith.constant 0 : i32
    return %c0_i32, %c0_i32_0 : i32, i32
  }
  func.func @transform_4(%arg0: i32) -> (i32, i32) {
    %c0_i32 = arith.constant 0 : i32
    %c0_i32_0 = arith.constant 0 : i32
    %c0_i32_1 = arith.constant 0 : i32
    return %c0_i32, %c0_i32_0 : i32, i32
  }
  func.func @transform_5(%arg0: i32) -> (i32, i32, i32) {
    %c0_i32 = arith.constant 0 : i32
    %c0_i32_0 = arith.constant 0 : i32
    %c0_i32_1 = arith.constant 0 : i32
    return %arg0, %c0_i32, %c0_i32_0 : i32, i32, i32
  }
}

</mosaic_0001>

<bundles_post_ra>
// kernel: tpu_custom_call.1
= control target key start
LH: loop header
LB: loop body
LE: loop exit
PB: predicated region body
PF: predicated region fallthrough
CT: control target
= control target key end

     0   :  { %s1789_s0 = inlined_call_operand.hbm [shape: f32[2,8,32], index: 0, kind: input, shape index: {}]   ;;  %s1790_s1 = inlined_call_operand.hbm [shape: f32[32,112], index: 1, kind: input, shape index: {}]   ;;  %s1791_s2 = inlined_call_operand.vmem [shape: f32[1,112], index: 2, kind: input, shape index: {}]   ;;  %s1792_s3 = inlined_call_operand.vmem [shape: f32[1,32], index: 3, kind: input, shape index: {}]   ;;  %s1793_s4 = inlined_call_operand.<no memory space> [shape: f32[1,1], index: 4, kind: input, shape index: {}]   ;;  %s1794_s5 = inlined_call_operand.hbm [shape: f32[2,1,16], index: 5, kind: output, shape index: {}]  }
   0x1   :  { %v10_v0 = vstv %s1793_s4 }
   0x2   :  { %11 = vst [vmem:[#allocation2] sm:$0x1] %v10_v0 }
   0x3   :  { %12 = vsyncpa [#allocation4], 0 }
   0x4   :  { %14 = vsyncpa [#allocation4 + $0x1], 0 }
   0x5   :  { %15 = vsyncpa [#allocation7], 0 }
   0x6   :  { %16 = vsyncpa [#allocation5], 0 }
   0x7   :  { %18 = vsyncpa [#allocation5 + $0x1], 0  ;;  %s1542_s20 = smov 0   ;;  %s1544_s21 = smov 0  }
   0x8   :  { %s1546_s22 = smov 0   ;;  %s1548_s23 = smov 0  }
   0x9 LB: > { %s1563_s4 = sadd.s32 4294967295, %s1487_s23   ;;  %s1168_s24 = sadd.s32 4294967294, %s1487_s23   ;;  %s1487_s23 = sphi %s1548_s23, %s1816_s23   ;;  %s1483_s22 = sphi %s1546_s22, %s1815_s22   ;;  %s1479_s21 = sphi %s1544_s21, %s1814_s21   ;;  %s1475_s20 = sphi %s1542_s20, %s1813_s20  }
   0xa   : > { %p44_p0 = scmp.ne.s32.totalorder %s1479_s21, %s1475_s20  ;;  %p1795_p1 = scmp.eq.s32.totalorder %s1563_s4, 0 }
   0xb   : > { %p158_p3 = scmp.eq.s32.totalorder %s1168_s24, 1  ;;  %p1169_p5 = scmp.ge.s32.totalorder %s1487_s23, 1 }
   0xc   : > { %p1572_p4 = por %p1795_p1, %p44_p0  ;;  %p165_p7 = scmp.lt.s32.totalorder %s1487_s23, 3 }
   0xd   : > { %p1577_p6 = por %p158_p3, %p44_p0  ;;  %s1489_s28 = smov [#allocation6]  }
   0xe   : > { %s1799_s25 = scalar_select %p1572_p4, 1, 0 }
   0xf   : > { %s1800_s26 = scalar_select %p1577_p6, 1, 0 }
  0x10   : > { %p1582_p8 = pnand %p1169_p5, %p165_p7  ;;  %s177_s29 = sshll.u32 %s1489_s28, 4  ;;  %s178_s29 = int_to_ptr.vmem [resolvable:$true] %s177_s29 }
  0x11   : > { %s1596_s6 = sadd.s32 1, %s1487_s23   ;;  %s31_s7 = sadd.s32 1, %s1483_s22 }
  0x12   : > { %s1801_s27 = scalar_select %p1582_p8, 1, 0 }
  0x13   : > { %p1277_p9 = pneg %p1582_p8  ;;  %s28_s8 = ssub.s32 %s1487_s23, %s1596_s6 }
  0x14   : > { %s1376_s9 = scalar_lea.vmem %s178_s29, 512  ;;  %p1384_p5 = scmp.lt.s32.totalorder %s178_s29, %s178_s29 }
  0x15   : > { %p1591_p11 = pnand %p1277_p9, %p1795_p1  ;;  %p1377_p13 = scmp.ne.s32.totalorder %s178_s29, %s1376_s9 }
  0x16   : > { %p1385_p7 = scmp.lt.s32.totalorder %s1376_s9, %s1376_s9 }
  0x17   : > { %p1367_p12 = pneg %p1591_p11 }
  0x18   : > { %p1386_p10 = por %p1385_p7, %p1384_p5 }
  0x19   : > { %p1379_p0 = pnand %p1377_p13, %p1367_p12 }
  0x1b   : > { %p1380_p3 = pneg %p1379_p0 }
  0x1d   : > { %p1387_p2 = pnand %p1386_p10, %p1380_p3 }
  0x1f   : > { %1390 = shalt.err (!%p1387_p2)
}
  0x20   : > { %s1490_s10 = smov 128   ;;  %s1491_s11 = smov 8  }
  0x21   : > { %1280 = dma.hbm_to_vmem [thread:$0]  (!%p1591_p11), %s1790_s1, 512, %s178_s29, [#allocation7], %s1490_s10, %s1490_s10, %s1491_s11  }
  0x22   : > { %p29_p9 = scmp.eq.s32.totalorder %s28_s8, 0  ;;  %p38_p12 = scmp.ne.s32.totalorder %s1483_s22, %s1479_s21 }
  0x23   : > { %p39_p10 = scmp.eq.s32.totalorder %s1487_s23, 0  ;;  %p1290_p2 = scmp.lt.s32.totalorder %s1487_s23, 2 }
  0x24   : > { %s1613_s14 = scalar_select %p29_p9, %s1483_s22, %s31_s7  }
  0x25   : > { %p40_p13 = por %p39_p10, %p38_p12  ;;  %p1803_p0 = scmp.eq.s32.totalorder %s1563_s4, 1 }
  0x26   : > { %s200_s16 = sand.u32 1, %s1483_s22   ;;  %s1173_s17 = sshll.u32 %s1487_s23, 7 }
  0x27   : > { %p1617_p3 = por %p1803_p0, %p38_p12  ;;  %s1172_s18 = sshll.u32 %s200_s16, 3 }
  0x28   : > { %s1626_s28 = scalar_lea.hbm %s1789_s0, %s1173_s17  ;;  %s204_s29 = scalar_lea.vmem [#allocation3], %s1172_s18 }
  0x29   : > { %s1804_s15 = scalar_select %p1617_p3, 1, 0 }
  0x2a   : > { %s211_s30 = sshll.u32 %s204_s29, 4  ;;  %p1628_p11 = pnand %p1290_p2, %p40_p13  ;;  %s212_s30 = int_to_ptr.vmem [resolvable:$true] %s211_s30 }
  0x2b   : > { %s201_s8 = scalar_lea.sflag [#allocation4], %s200_s16  ;;  %s1391_s9 = scalar_lea.hbm %s1626_s28, 128 }
  0x2c   : > { %p1392_p5 = scmp.ne.s32.totalorder %s1626_s28, %s1391_s9  ;;  %p1393_p7 = pneg %p1628_p11 }
  0x2d   : > { %s1396_s12 = scalar_lea.hbm %s1789_s0, 256  ;;  %p1397_p10 = scmp.lt.s32.totalorder %s1626_s28, %s1789_s0 }
  0x2e   : > { %p1394_p9 = pnand %p1393_p7, %p1392_p5  ;;  %p1398_p2 = scmp.lt.s32.totalorder %s1396_s12, %s1391_s9 }
  0x30   : > { %p1395_p12 = pneg %p1394_p9  ;;  %p1399_p13 = por %p1398_p2, %p1397_p10 }
  0x32   : > { %p1400_p0 = pnand %p1399_p13, %p1395_p12 }
  0x34   : > { %1403 = shalt.err (!%p1400_p0)
}
  0x35   : > { %s1404_s18 = scalar_lea.vmem %s212_s30, 128  ;;  %s1492_s16 = smov [#allocation3]  }
  0x36   : > { %p1405_p1 = scmp.ne.s32.totalorder %s212_s30, %s1404_s18  ;;  %s1409_s19 = sshll.u32 %s1492_s16, 4  ;;  %s1410_s19 = int_to_ptr.vmem [resolvable:$false] %s1409_s19 }
  0x37   : > { %s1411_s24 = scalar_lea.vmem %s1410_s19, 256  ;;  %p1412_p5 = scmp.lt.s32.totalorder %s212_s30, %s1410_s19 }
  0x38   : > { %p1407_p6 = pnand %p1405_p1, %p1393_p7  ;;  %p1413_p9 = scmp.lt.s32.totalorder %s1411_s24, %s1404_s18 }
  0x3a   : > { %p1408_p3 = pneg %p1407_p6  ;;  %p1414_p4 = por %p1413_p9, %p1412_p5 }
  0x3c   : > { %p1415_p8 = pnand %p1414_p4, %p1408_p3 }
  0x3e   : > { %1418 = shalt.err (!%p1415_p8)
}
  0x3f   : > { %1284 = dma.hbm_to_vmem [thread:$0]  (!%p1628_p11), %s1626_s28, 128, %s212_s30, %s201_s8  }
  0x40   : > { %p1806_p12 = scmp.ne.s32.totalorder %s1801_s27, 0 }
  0x41   : > { %s1649_s29 = sand.u32 (!%p1806_p12), 1, %s1479_s21   ;;  %p1807_p1 = scmp.ne.s32.totalorder (!%p1806_p12), %s1799_s25, 0 }
  0x42   : > { %220 = sbr.rel (%p1806_p12) target bundleno = 1606 (0x646), region = 40  ;;  %s1175_s9 = sshll.u32 (!%p1806_p12), %s1649_s29, 3 }
  0x43   : > { %s223_s10 = scalar_lea.sflag (!%p1806_p12), [#allocation4], %s1649_s29  ;;  %s226_s11 = scalar_lea.vmem (!%p1806_p12), [#allocation3], %s1175_s9 }
  0x47   : > { %1462 = dma.done.wait (%p1807_p1), %s223_s10, 128  }
  0x48   : > { %1464 = vsyncadd (%p1807_p1), %s223_s10, 4294967168  ;;  %p1808_p4 = scmp.eq.s32.totalorder %s1563_s4, 0 }
  0x4a   : > { %1466 = dma.done.wait (%p1808_p4), [#allocation7], 512   ;;  %p1809_p6 = pmov %p1808_p4 }
  0x4b   : > { %v1493_v1 = vmov 0.0   ;;  %vm1494_vm0 = vmmov 0   ;;  %v260_v2 = vld [vmem:[#allocation6 + $0x18] sm:$0xff]  ;;  %v259_v3 = vld [vmem:[#allocation6 + $0x10] sm:$0xff]  ;;  %v258_v4 = vld [vmem:[#allocation6 + $0x8] sm:$0xff]  ;;  %vm268_vm1 = vcmask 261120  }
  0x4c   : > { %1468 = vsyncadd (%p1809_p6), [#allocation7], 4294966784  ;;  %1218 = vmatprep.subr.mxu0 %v1493_v1  ;;  %1226 = vmatprep.mubr.msk.f32.mxu0 %vm1494_vm0, %v1493_v1  ;;  %v257_v5 = vld [vmem:[#allocation6] sm:$0xff]  ;;  %v256_v6 = vld [vmem:[%s226_s11] sm:$0xff]  ;;  %s1495_s28 = smov 120   ;;  %s1496_s30 = smov 96  }
  0x4d   : > { %1229 = vmatprep.subr.mxu1 %v1493_v1  ;;  %1231 = vmatprep.mubr.msk.f32.mxu1 %vm1494_vm0, %v1493_v1  ;;  %v1177_v7 = vld [vmem:[%s1791_s2] ss:$0 sm:$0xff]  ;;  %s1497_s7 = smov 80   ;;  %s1498_s8 = smov 88   ;;  %vm359_vm3 = vcmask 64512   ;;  %vm1065_vm4 = vcmask 917248  }
  0x4e   : > { %1219 = vmatpush3.msra.mxu0 %v260_v2  ;;  %s1499_s12 = smov 72   ;;  %s1500_s13 = smov 112   ;;  %v1184_v59 = vld [vmem:[%s1792_s3] ss:$0 sm:$0xff]  ;;  %vm1077_vm5 = vcmask 122880  }
  0x4f   : > { %1220 = vmatprep.subr.mxu0 %v1493_v1  ;;  %s1501_s17 = smov 104   ;;  %s1502_s18 = smov 56  }
  0x50   : > { %1221 = vmatpush3.msra.mxu0 %v259_v3  ;;  %s1503_s16 = smov 64   ;;  %s1504_s19 = smov 48  }
  0x51   : > { %1222 = vmatprep.subr.mxu0 %v1493_v1  ;;  %s1505_s24 = smov 40   ;;  %s1507_s11 = smov 32  }
  0x52   : > { %1223 = vmatpush3.msra.mxu0 %v258_v4  ;;  %s1194_s25 = sshll.u32 %s1563_s4, 4  ;;  %s255_s27 = scalar_lea.vmem [#allocation8], %s1649_s29 }
  0x53   : > { %1224 = vmatprep.subr.mxu0 %v1493_v1  ;;  %p1810_p3 = scmp.ne.s32.totalorder %s1804_s15, 0 }
  0x54   : > { %1225 = vmatpush3.msra.mxu0 %v257_v5 }
  0x55   : > { %1227 = vmatmul.mubr.msk.f32.vlgmr.msra.gmra.mxu0 %vm268_vm1, %v256_v6  ;;  %1239 = vmatprep.subr.mxu0 %v1493_v1 }
  0x56   : > { %1241 = vmatprep.mubr.msk.f32.mxu0 %vm1494_vm0, %v1493_v1 }
 0x115   : > { %v338_v8 = vpop.f32.mrf.mxu0 }
 0x116   : > { %v1676_v9 = vadd.f32 %v1177_v7, %v338_v8 }
 0x117   : > { %v1228_v10 = vpop.f32.mrf.mxu0 }
 0x118   : > { %v343_v11 = vmin.f32 %v1676_v9, 0.0  ;;  %vm342_vm2 = vcmp.gt.f32.partialorder %v1676_v9, 0.0 }
 0x11a   : > { %v344_v12 = vmul.f32 1.442695, %v343_v11 }
 0x11c   : > { %1345 = vpow2.f32 %v344_v12 }
 0x129   : > { %v1346_v13 = vpop.eup %1345 }
 0x12a   : > { %v1179_v14 = vadd.f32 -1.0, %v1346_v13 }
 0x12c   : > { %v1681_v15 = vsel %vm342_vm2, %v1676_v9, %v1179_v14 }
 0x12d   : > { %533 = vrot.lane.b32.xlu1 %v1681_v15, %s1495_s28  ;;  %357 = vrot.lane.b32.xlu0 %v1681_v15, %s1496_s30 }
 0x131   : > { %709 = vrot.lane.b32.xlu1 %v1681_v15, %s1497_s7  ;;  %535 = vrot.lane.b32.xlu0 %v1681_v15, %s1498_s8  ;;  %s1752_s8 = scalar_lea.hbm %s1794_s5, %s1194_s25 }
 0x135   : > { %883 = vrot.lane.b32.xlu1 %v1681_v15, %s1499_s12  ;;  %707 = vrot.lane.b32.xlu0 %v1681_v15, %s1500_s13  ;;  %s1080_s12 = scalar_lea.sflag [#allocation5], %s1649_s29 }
 0x139   : > { %881 = vrot.lane.b32.xlu0 %v1681_v15, %s1501_s17 }
 0x19f   : > { %v534_v16 = vpop.permute.xlu1 %533  ;;  %v358_v17 = vpop.permute.xlu0 %357 }
 0x1a0   : > { %1230 = vmatpush3.xpose.msk.msra.mxu1 %vm359_vm3, %v358_v17 }
 0x1a1   : > { %1234 = vmatprep.subr.mxu1 %v1493_v1 }
 0x1a3   : > { %1232 = vmatmul.mubr.msk.f32.vlgmr.msra.gmra.mxu1 %vm359_vm3, %v1681_v15  ;;  %v536_v18 = vpop.permute.xlu0 %535  ;;  %v710_v19 = vpop.permute.xlu1 %709 }
 0x1a4   : > { %1240 = vmatpush3.xpose.msk.msra.mxu0 %vm359_vm3, %v536_v18  ;;  %1236 = vmatprep.mubr.msk.f32.mxu1 %vm1494_vm0, %v1493_v1 }
 0x1a5   : > { %1249 = vmatprep.subr.mxu0 %v1493_v1 }
 0x1a7   : > { %1242 = vmatmul.mubr.msk.f32.vlgmr.msra.gmra.mxu0 %vm359_vm3, %v534_v16  ;;  %v708_v20 = vpop.permute.xlu0 %707  ;;  %v884_v21 = vpop.permute.xlu1 %883 }
 0x1a8   : > { %1250 = vmatpush3.xpose.msk.msra.mxu0 %vm359_vm3, %v710_v19  ;;  %1251 = vmatprep.mubr.msk.f32.mxu0 %vm1494_vm0, %v1493_v1 }
 0x1a9   : > { %1259 = vmatprep.subr.mxu0 %v1493_v1 }
 0x1ab   : > { %1252 = vmatmul.mubr.msk.f32.vlgmr.msra.gmra.mxu0 %vm359_vm3, %v708_v20  ;;  %v882_v22 = vpop.permute.xlu0 %881 }
 0x1ac   : > { %1260 = vmatpush3.xpose.msk.msra.mxu0 %vm359_vm3, %v884_v21  ;;  %1261 = vmatprep.mubr.msk.f32.mxu0 %vm1494_vm0, %v1493_v1 }
 0x1af   : > { %1262 = vmatmul.mubr.msk.f32.vlgmr.msra.gmra.mxu0 %vm359_vm3, %v882_v22 }
 0x263   : > { %v430_v23 = vpop.f32.mrf.mxu1 }
 0x264   : > { %v434_v24 = vmul.f32 0.35355338, %v430_v23 }
 0x265   : > { %v1233_v25 = vpop.f32.mrf.mxu1 }
 0x266   : > { %v435_v26 = vsel %vm359_vm3, %v434_v24, -inf }
 0x267   : > { %436 = vmax.xlane.f32.xlu1 %v435_v26  ;;  %v607_v27 = vpop.f32.mrf.mxu0 }
 0x268   : > { %v611_v28 = vmul.f32 0.35355338, %v607_v27 }
 0x269   : > { %v1243_v29 = vpop.f32.mrf.mxu0 }
 0x26a   : > { %v612_v30 = vsel %vm359_vm3, %v611_v28, -inf }
 0x26b   : > { %613 = vmax.xlane.f32.xlu0 %v612_v30  ;;  %v781_v31 = vpop.f32.mrf.mxu0 }
 0x26c   : > { %v785_v32 = vmul.f32 0.35355338, %v781_v31 }
 0x26d   : > { %v1253_v33 = vpop.f32.mrf.mxu0 }
 0x26e   : > { %v786_v34 = vsel %vm359_vm3, %v785_v32, -inf  ;;  %v1180_v33 = vld [vmem:[#allocation2] ss:$0 sm:$0xff] }
 0x26f   : > { %787 = vmax.xlane.f32.xlu0 %v786_v34  ;;  %v955_v35 = vpop.f32.mrf.mxu0 }
 0x270   : > { %v959_v36 = vmul.f32 0.35355338, %v955_v35 }
 0x271   : > { %v1263_v37 = vpop.f32.mrf.mxu0 }
 0x272   : > { %v960_v38 = vsel %vm359_vm3, %v959_v36, -inf }
 0x273   : > { %961 = vmax.xlane.f32.xlu1 %v960_v38 }
 0x284   : > { %623 = vrot.lane.b32.xlu1 %v1681_v15, %s1502_s18 }
 0x2f0   : > { %v437_v39 = vpop.xlane.xlu1 %436 }
 0x2f1   : > { %v438_v40 = vsub.f32 %v434_v24, %v437_v39 }
 0x2f3   : > { %v439_v41 = vmul.f32 1.442695, %v438_v40 }
 0x2f4   : > { %v614_v42 = vpop.xlane.xlu0 %613 }
 0x2f5   : > { %1347 = vpow2.f32 %v439_v41  ;;  %v615_v43 = vsub.f32 %v611_v28, %v614_v42 }
 0x2f7   : > { %v616_v44 = vmul.f32 1.442695, %v615_v43 }
 0x2f8   : > { %v788_v54 = vpop.xlane.xlu0 %787 }
 0x2f9   : > { %1349 = vpow2.f32 %v616_v44  ;;  %v789_v55 = vsub.f32 %v785_v32, %v788_v54  ;;  %v1506_v32 = vmov 0  }
 0x2fa   : > { %1343 = vset.pattern.permute.xlu1 %v1506_v32  ;;  %1344 = vset.pattern.permute.xlu0 %v1506_v32 }
 0x2fb   : > { %v790_v56 = vmul.f32 1.442695, %v789_v55 }
 0x2fc   : > { %v962_v45 = vpop.xlane.xlu1 %961 }
 0x2fd   : > { %v963_v46 = vsub.f32 %v959_v36, %v962_v45 }
 0x2ff   : > { %v964_v47 = vmul.f32 1.442695, %v963_v46 }
 0x300   : > { %v624_v60 = vpop.permute.xlu1 %623 }
 0x301   : > { %1351 = vpow2.f32 %v964_v47 }
 0x302   : > { %v1348_v48 = vpop.eup %1347  ;;  %1353 = vpow2.f32 %v790_v56 }
 0x303   : > { %v441_v49 = vsel %vm359_vm3, %v1348_v48, 0.0 }
 0x304   : > { %442 = vadd.xlane.f32.xlu0 %v441_v49 }
 0x306   : > { %v1350_v50 = vpop.eup %1349 }
 0x307   : > { %v618_v51 = vsel %vm359_vm3, %v1350_v50, 0.0 }
 0x308   : > { %619 = vadd.xlane.f32.xlu1 %v618_v51 }
 0x30e   : > { %v1352_v52 = vpop.eup %1351 }
 0x30f   : > { %v966_v53 = vsel %vm359_vm3, %v1352_v52, 0.0  ;;  %v1354_v57 = vpop.eup %1353 }
 0x310   : > { %967 = vadd.xlane.f32.xlu1 %v966_v53  ;;  %v792_v58 = vsel %vm359_vm3, %v1354_v57, 0.0 }
 0x31a   : > { %446 = vrot.lane.b32.xlu0 %v1681_v15, %s1503_s16 }
 0x321   : > { %797 = vrot.lane.b32.xlu1 %v1681_v15, %s1504_s19 }
 0x325   : > { %699 = vrot.lane.b32.xlu1 %v1184_v59, %s1495_s28  ;;  %s1092_s28 = sshll.u32 %s255_s27, 4  ;;  %s1093_s28 = int_to_ptr.vmem [resolvable:$true] %s1092_s28 }
 0x329   : > { %1047 = vrot.lane.b32.xlu1 %v1184_v59, %s1501_s17  ;;  %s1508_s17 = smov [#allocation8]  }
 0x32a   : > { %s1423_s18 = sshll.u32 %s1508_s17, 4  ;;  %s1424_s18 = int_to_ptr.vmem [resolvable:$false] %s1423_s18 }
 0x32b   : > { %s1425_s4 = scalar_lea.vmem %s1424_s18, 32  ;;  %p1426_p10 = scmp.lt.s32.totalorder %s1093_s28, %s1424_s18 }
 0x339   : > { %793 = vadd.xlane.f32.xlu0 %v792_v58 }
 0x34f   : > { %971 = vrot.lane.b32.xlu0 %v1681_v15, %s1505_s24 }
 0x353   : > { %873 = vrot.lane.b32.xlu0 %v1184_v59, %s1500_s13  ;;  %s1419_s13 = scalar_lea.vmem %s1093_s28, 16 }
 0x354   : > { %p1420_p8 = scmp.ne.s32.totalorder %s1093_s28, %s1419_s13  ;;  %p1427_p2 = scmp.lt.s32.totalorder %s1425_s4, %s1419_s13 }
 0x356   : > { %p1421_p11 = pnand %p1420_p8, %p1810_p3  ;;  %p1428_p13 = por %p1427_p2, %p1426_p10 }
 0x358   : > { %p1422_p7 = pneg %p1421_p11 }
 0x35a   : > { %p1429_p0 = pnand %p1428_p13, %p1422_p7 }
 0x38d   : > { %v443_v61 = vpop.xlane.xlu0 %442 }
 0x38e   : > { %1355 = vrcp.f32 %v443_v61 }
 0x391   : > { %v447_v62 = vpop.permute.xlu0 %446  ;;  %v620_v63 = vpop.xlane.xlu1 %619 }
 0x392   : > { %1357 = vrcp.f32 %v620_v63  ;;  %1235 = vmatpush3.msra.mxu1 %v447_v62 }
 0x393   : > { %1244 = vmatprep.subr.mxu1 %v1493_v1 }
 0x399   : > { %v968_v2 = vpop.xlane.xlu1 %967 }
 0x39b   : > { %v1356_v0 = vpop.eup %1355 }
 0x39c   : > { %v445_v3 = vmul.f32 %v1356_v0, %v1348_v48 }
 0x39d   : > { %v798_v6 = vpop.permute.xlu1 %797 }
 0x39e   : > { %1237 = vmatmul.mubr.msk.f32.vlgmr.msra.gmra.mxu1 %vm359_vm3, %v445_v3 }
 0x39f   : > { %v1358_v4 = vpop.eup %1357  ;;  %1245 = vmatpush3.msra.mxu1 %v624_v60  ;;  %1246 = vmatprep.mubr.msk.f32.mxu1 %vm1494_vm0, %v1493_v1 }
 0x3a0   : > { %1254 = vmatprep.subr.mxu1 %v1493_v1  ;;  %v622_v5 = vmul.f32 %v1358_v4, %v1350_v50 }
 0x3a1   : > { %v700_v17 = vpop.permute.xlu1 %699 }
 0x3a2   : > { %1247 = vmatmul.mubr.msk.f32.vlgmr.msra.gmra.mxu1 %vm359_vm3, %v622_v5 }
 0x3a3   : > { %1255 = vmatpush3.msra.mxu1 %v798_v6  ;;  %1256 = vmatprep.mubr.msk.f32.mxu1 %vm1494_vm0, %v1493_v1 }
 0x3a4   : > { %1264 = vmatprep.subr.mxu1 %v1493_v1 }
 0x3a5   : > { %v1048_v26 = vpop.permute.xlu1 %1047 }
 0x3c2   : > { %v794_v7 = vpop.xlane.xlu0 %793 }
 0x3c3   : > { %1359 = vrcp.f32 %v794_v7 }
 0x3c4   : > { %1361 = vrcp.f32 %v968_v2 }
 0x3c6   : > { %v972_v12 = vpop.permute.xlu0 %971 }
 0x3ca   : > { %v874_v23 = vpop.permute.xlu0 %873 }
 0x3d0   : > { %v1360_v8 = vpop.eup %1359 }
 0x3d1   : > { %v796_v10 = vmul.f32 %v1360_v8, %v1354_v57  ;;  %v1362_v11 = vpop.eup %1361 }
 0x3d2   : > { %v970_v13 = vmul.f32 %v1362_v11, %v1352_v52 }
 0x3d3   : > { %1257 = vmatmul.mubr.msk.f32.vlgmr.msra.gmra.mxu1 %vm359_vm3, %v796_v10 }
 0x3d4   : > { %1265 = vmatpush3.msra.mxu1 %v972_v12  ;;  %1266 = vmatprep.mubr.msk.f32.mxu1 %vm1494_vm0, %v1493_v1 }
 0x3d7   : > { %1267 = vmatmul.mubr.msk.f32.vlgmr.msra.gmra.mxu1 %vm359_vm3, %v970_v13 }
 0x45e   : > { %v518_v14 = vpop.f32.mrf.mxu1 }
 0x45f   : > { %v528_v15 = vmul.f32 %v1184_v59, %v518_v14 }
 0x460   : > { %v1238_v16 = vpop.f32.mrf.mxu1 }
 0x461   : > { %v529_v18 = vsel %vm359_vm3, %v528_v15, 0.0 }
 0x462   : > { %530 = vadd.xlane.f32.xlu0 %v529_v18  ;;  %v695_v19 = vpop.f32.mrf.mxu1 }
 0x463   : > { %v702_v20 = vmul.f32 %v700_v17, %v695_v19 }
 0x464   : > { %v1248_v21 = vpop.f32.mrf.mxu1 }
 0x465   : > { %v703_v22 = vsel %vm359_vm3, %v702_v20, 0.0 }
 0x466   : > { %704 = vadd.xlane.f32.xlu1 %v703_v22 }
 0x493   : > { %v869_v24 = vpop.f32.mrf.mxu1 }
 0x494   : > { %v876_v25 = vmul.f32 %v874_v23, %v869_v24 }
 0x495   : > { %v1258_v1 = vpop.f32.mrf.mxu1 }
 0x496   : > { %v877_v27 = vsel %vm359_vm3, %v876_v25, 0.0 }
 0x497   : > { %878 = vadd.xlane.f32.xlu0 %v877_v27  ;;  %v1043_v28 = vpop.f32.mrf.mxu1 }
 0x498   : > { %v1050_v29 = vmul.f32 %v1048_v26, %v1043_v28 }
 0x499   : > { %v1268_v30 = vpop.f32.mrf.mxu1 }
 0x49a   : > { %v1051_v31 = vsel %vm359_vm3, %v1050_v29, 0.0 }
 0x49b   : > { %1052 = vadd.xlane.f32.xlu0 %v1051_v31 }
 0x4eb   : > { %v531_v34 = vpop.xlane.xlu0 %530 }
 0x4ec   : > { %v532_v36 = vadd.f32 %v1180_v33, %v531_v34 }
 0x4ef   : > { %v705_v35 = vpop.xlane.xlu1 %704 }
 0x4f0   : > { %v706_v38 = vadd.f32 %v705_v35, %v532_v36 }
 0x520   : > { %v879_v37 = vpop.xlane.xlu0 %878 }
 0x521   : > { %v880_v39 = vadd.f32 %v879_v37, %v706_v38 }
 0x524   : > { %v1053_v40 = vpop.xlane.xlu0 %1052 }
 0x525   : > { %v1054_v41 = vadd.f32 %v1053_v40, %v880_v39 }
 0x527   : > { %v1055_v42 = vand.u32 2147483647, %v1054_v41 }
 0x529   : > { %v1056_v43 = vadd.f32 1.0, %v1055_v42 }
 0x52b   : > { %1363 = vrcp.f32 %v1056_v43 }
 0x538   : > { %v1364_v44 = vpop.eup %1363 }
 0x539   : > { %v1058_v45 = vmul.f32 %v1364_v44, %v1054_v41 }
 0x53b   : > { %1061 = vperm.xlu1 %1343, %v1058_v45  }
 0x5b6   : > { %v1062_v46 = vpop.permute.xlu1 %1061 }
 0x5b7   : > { %v1064_v47 = vmul.f32 %v1062_v46, %v1676_v9 }
 0x5b9   : > { %v1066_v48 = vsel %vm1065_vm4, %v1064_v47, 0.0 }
 0x5ba   : > { %v1067_v49 = vrot.slane %v1066_v48, 4 }
 0x5bc   : > { %v1068_v50 = vadd.f32 %v1067_v49, %v1066_v48 }
 0x5be   : > { %v1069_v51 = vrot.slane %v1068_v50, 2 }
 0x5c0   : > { %v1070_v52 = vadd.f32 %v1069_v51, %v1068_v50 }
 0x5c2   : > { %v1071_v53 = vrot.slane %v1070_v52, 1 }
 0x5c4   : > { %v1072_v54 = vadd.f32 %v1071_v53, %v1070_v52 }
 0x5c6   : > { %1074 = vrot.lane.b32.xlu0 %v1072_v54, %s1507_s11 }
 0x638   : > { %v1075_v9 = vpop.permute.xlu0 %1074 }
 0x639   : > { %1078 = vst.msk [vmem:[%s255_s27] sm:$0x1] %vm1077_vm5, %v1075_v9 }
 0x63a   : > { %1432 = shalt.err (!%p1429_p0)
}
 0x63b   : > { %s1433_s16 = scalar_lea.hbm %s1752_s8, 16  ;;  %s1437_s24 = scalar_lea.hbm %s1794_s5, 32 }
 0x63c   : > { %p1434_p5 = scmp.ne.s32.totalorder %s1752_s8, %s1433_s16  ;;  %p1438_p1 = scmp.lt.s32.totalorder %s1752_s8, %s1794_s5 }
 0x63d   : > { %p1439_p4 = scmp.lt.s32.totalorder %s1437_s24, %s1433_s16 }
 0x63e   : > { %p1435_p9 = pnand %p1434_p5, %p1810_p3 }
 0x63f   : > { %p1440_p6 = por %p1439_p4, %p1438_p1 }
 0x640   : > { %p1436_p12 = pneg %p1435_p9 }
 0x642   : > { %p1441_p8 = pnand %p1440_p6, %p1436_p12 }
 0x644   : > { %1444 = shalt.err (!%p1441_p8)
}
 0x645   : > { %1275 = dma.vmem_to_hbm [thread:$0]  (%p1810_p3), %s1093_s28, 16, %s1752_s8, %s1080_s12  }
 0x646 PF: > { %s1104_s11 = sand.u32 1, %s1475_s20   ;;  %p1811_p11 = scmp.ne.s32.totalorder %s1800_s26, 0 }
 0x647   : > { %p1812_p7 = scmp.ge.s32.totalorder %s1487_s23, 2  ;;  %s1105_s25 = scalar_lea.sflag [#allocation5], %s1104_s11 }
 0x649   : > { %p1286_p10 = pnand %p1812_p7, %p1811_p11 }
 0x64b   : > { %p1287_p2 = pneg %p1286_p10 }
 0x64d   : > { %1470 = dma.done.wait (%p1287_p2), %s1105_s25, 16  }
 0x64e   : > { %1472 = vsyncadd (%p1287_p2), %s1105_s25, 4294967280  ;;  %p21_p13 = scmp.ge.s32.totalorder %s1596_s6, 4   ;;  %s1813_s20 = smov %s1479_s21 }
 0x64f   : > { %s1814_s21 = smov %s1483_s22  ;;  %s1815_s22 = smov %s1613_s14 }
 0x650   : > { %s1816_s23 = smov %s1596_s6  ;;  %23 = sbr.rel (!%p21_p13) target bundleno = 9 (0x9), region = 89 }
 0x655   :  { %1109 = vsyncpa [#allocation4], 1 }
 0x656   :  { %1111 = vsyncpa [#allocation4 + $0x1], 1 }
 0x657   :  { %1112 = vsyncpa [#allocation7], 1 }
 0x658   :  { %1113 = vsyncpa [#allocation5], 1 }
 0x659   :  { %1115 = vsyncpa [#allocation5 + $0x1], 1 }

</bundles_post_ra>
